<compile_context>
chip_gen: v6e
topology: v6e:2x2x1
jax: 0.10.0
libtpu: 0.0.40
codegen_flags: <defaults>
</compile_context>

<pallas_src>
import math

import jax
import jax.numpy as jnp
from jax.experimental import pallas as pl
from jax.experimental.pallas import tpu as pltpu

_LANE = 128                     # TPU vreg lane width
_MAX_TILE_D = 2048              # max lanes per block along the channel axis
_TARGET_TILE_BYTES = 8 << 20    # ~8 MiB of x per block
_VMEM_CAP_BYTES = 48 << 20      # leave headroom vs v7x's 64 MiB/TC physical VMEM
_MIN_GRID_BLOCKS = 4            # >=2 blocks per TensorCore on v7x (2 TCs/chip)


def _layerscale_kernel(x_ref, g_ref, o_ref):
    # x_ref: (tile_rows, tile_d) block; g_ref: (1, tile_d) gamma row, broadcast over
    # rows by the VPU.  Multiply in the promoted dtype (f32 if gamma is f32), then
    # downcast on store -- matches an f32-multiply-then-downcast reference.
    o_ref[...] = (x_ref[...] * g_ref[...]).astype(o_ref.dtype)


def layer_scale(x, gamma):
    """LayerScale forward: x * gamma, gamma broadcast over the last dim.

    x: (..., D); gamma: (D,). Returns an array with x's shape and dtype.
    """
    orig_shape = x.shape
    D = orig_shape[-1]
    out_dtype = x.dtype
    itemsize = jnp.dtype(x.dtype).itemsize
    total = x.size

    # ---- Pick a lane-dense 2-D view of x ------------------------------------
    if D % _LANE == 0:
        # Channel dim already 128-aligned: keep the (R, D) view.
        x2 = x.reshape(-1, D)
        g2 = gamma.reshape(1, D)
        lane_dim = D
    else:
        # Fold rows into lanes so the last dim presented to the kernel is a multiple
        # of 128 (unmasked vector stores); gamma is tiled to match the folded groups.
        fold = (D * _LANE) // math.gcd(D, _LANE)  # lcm(D, 128)
        if total % fold == 0:
            lane_dim = fold
            x2 = x.reshape(-1, lane_dim)
            g2 = jnp.tile(gamma, lane_dim // D).reshape(1, lane_dim)
        else:
            # TODO(synk): awkward shapes keep narrow masked stores; padding the channel
            # dim to 128 in the wrapper costs a full extra HBM copy of x, so only do it
            # when this multiply is fused into a producer kernel.
            x2 = x.reshape(-1, D)
            g2 = gamma.reshape(1, D)
            lane_dim = D

    R = x2.shape[0]

    # ---- Tile sizes: byte target (no row cap) sets tile_rows -----------------
    if lane_dim % _LANE == 0 and lane_dim > _MAX_TILE_D:
        tile_d = _MAX_TILE_D
    else:
        tile_d = lane_dim

    sublane = 16 if itemsize < 4 else 8  # bf16 packs 2 rows/sublane
    rows_for_target = max(sublane, _TARGET_TILE_BYTES // (tile_d * itemsize))
    tile_rows = (rows_for_target // sublane) * sublane
    if R <= tile_rows:
        tile_rows = R  # full-extent block along rows is always legal

    n_row = pl.cdiv(R, tile_rows)
    n_col = pl.cdiv(lane_dim, tile_d)

    # Don't collapse to a single grid block: give v7x's two TensorCores work and the
    # pipeline something to overlap.  Irrelevant overhead on v5e/v6e.
    if n_row * n_col < _MIN_GRID_BLOCKS:
        want_rows = min(pl.cdiv(_MIN_GRID_BLOCKS, n_col), pl.cdiv(R, sublane))
        if want_rows > n_row:
            tile_rows = pl.cdiv(pl.cdiv(R, want_rows), sublane) * sublane
            n_row = pl.cdiv(R, tile_rows)

    grid = (n_row, n_col)

    tile_bytes = tile_rows * tile_d * itemsize
    # x in + out, each double-buffered, plus gamma and headroom; capped well below the
    # v7x per-TC VMEM so the compiler keeps room for internal scratch.
    vmem_limit = min(4 * tile_bytes + (8 << 20), _VMEM_CAP_BYTES)

    out = pl.pallas_call(
        _layerscale_kernel,
        out_shape=jax.ShapeDtypeStruct(x2.shape, out_dtype),
        grid_spec=pltpu.PrefetchScalarGridSpec(
            num_scalar_prefetch=0,
            grid=grid,
            in_specs=[
                pl.BlockSpec((tile_rows, tile_d), lambda i, j: (i, j)),
                pl.BlockSpec((1, tile_d), lambda i, j: (0, j)),
            ],
            out_specs=pl.BlockSpec((tile_rows, tile_d), lambda i, j: (i, j)),
        ),
        compiler_params=pltpu.CompilerParams(
            dimension_semantics=("parallel", "parallel"),
            vmem_limit_bytes=vmem_limit,
        ),
    )(x2, g2)
    return out.reshape(orig_shape)


if __name__ == "__main__":
    init_values = 1e-05
    key = jax.random.PRNGKey(0)

    # 1) Small transformer-style shape (B, seq, dim) with dim < 128
    #    (exercises the fold-rows-into-lanes path).
    B, N, D = 2, 8, 32
    gamma = init_values * jnp.ones((D,), dtype=jnp.float32)
    x = jax.random.normal(key, (B, N, D), dtype=jnp.float32)
    y = jax.block_until_ready(layer_scale(x, gamma))
    assert y.shape == x.shape and y.dtype == x.dtype
    assert jnp.allclose(y, x * gamma, atol=1e-6, rtol=1e-6)

    # 2) Lane-aligned channel dim, bf16 activations with an f32 gamma parameter
    #    (exercises the promoted-multiply-then-downcast path and the >=4-block split).
    k2 = jax.random.fold_in(key, 1)
    D2 = 256
    gamma2 = init_values * jnp.ones((D2,), dtype=jnp.float32)
    x2 = jax.random.normal(k2, (2, 64, D2)).astype(jnp.bfloat16)
    y2 = jax.block_until_ready(layer_scale(x2, gamma2))
    ref2 = (x2.astype(jnp.float32) * gamma2).astype(jnp.bfloat16)
    assert y2.shape == x2.shape and y2.dtype == x2.dtype
    assert jnp.allclose(y2.astype(jnp.float32), ref2.astype(jnp.float32),
                        rtol=1e-2, atol=1e-9)

    # 3) Ragged row count (exercises pl.cdiv tail blocks after the row re-split).
    k3 = jax.random.fold_in(key, 2)
    D3 = 128
    gamma3 = init_values * jnp.ones((D3,), dtype=jnp.float32)
    x3 = jax.random.normal(k3, (2, 600, D3), dtype=jnp.float32)
    y3 = jax.block_until_ready(layer_scale(x3, gamma3))
    assert jnp.allclose(y3, x3 * gamma3, atol=1e-6, rtol=1e-6)

    print("KERNEL_OK")
</pallas_src>

<mosaic_0001>
module attributes {stable_mosaic.version = 11 : i64} {
  func.func @_layerscale_kernel(%arg0: i32, %arg1: i32, %arg2: memref<4x128xf32, #tpu.memory_space<vmem>>, %arg3: memref<1x128xf32, #tpu.memory_space<vmem>>, %arg4: memref<4x128xf32, #tpu.memory_space<vmem>>) attributes {dimension_semantics = [#tpu.dimension_semantics<parallel>, #tpu.dimension_semantics<parallel>], iteration_bounds = array<i64: 1, 1>, scalar_prefetch = 0 : i64, scratch_operands = 0 : i64, tpu.core_type = #tpu.core_type<tc>, window_params = [{transform_indices = @transform_0, window_bounds = array<i64: 4, 128>}, {transform_indices = @transform_1, window_bounds = array<i64: 1, 128>}, {transform_indices = @transform_2, window_bounds = array<i64: 4, 128>}]} {
    %c0 = arith.constant 0 : index
    %c0_0 = arith.constant 0 : index
    %0 = vector.load %arg2[%c0, %c0_0] : memref<4x128xf32, #tpu.memory_space<vmem>>, vector<4x128xf32>
    %c0_1 = arith.constant 0 : index
    %c0_2 = arith.constant 0 : index
    %1 = vector.load %arg3[%c0_1, %c0_2] : memref<1x128xf32, #tpu.memory_space<vmem>>, vector<1x128xf32>
    %2 = vector.broadcast %1 : vector<1x128xf32> to vector<4x128xf32>
    %3 = arith.mulf %0, %2 : vector<4x128xf32>
    %c0_3 = arith.constant 0 : index
    %c0_4 = arith.constant 0 : index
    %4 = vector.load %arg4[%c0_3, %c0_4] : memref<4x128xf32, #tpu.memory_space<vmem>>, vector<4x128xf32>
    tpu.vector_store %arg4[%c0_3, %c0_4], %3 {strides = array<i32>} : memref<4x128xf32, #tpu.memory_space<vmem>>, vector<4x128xf32>,
    return
  }
  func.func @transform_0(%arg0: i32, %arg1: i32) -> (i32, i32) {
    %c0_i32 = arith.constant 0 : i32
    return %arg0, %arg1 : i32, i32
  }
  func.func @transform_1(%arg0: i32, %arg1: i32) -> (i32, i32) {
    %c0_i32 = arith.constant 0 : i32
    %c0_i32_0 = arith.constant 0 : i32
    return %c0_i32, %arg1 : i32, i32
  }
  func.func @transform_2(%arg0: i32, %arg1: i32) -> (i32, i32) {
    %c0_i32 = arith.constant 0 : i32
    return %arg0, %arg1 : i32, i32
  }
}

</mosaic_0001>

<bundles_post_ra>
// kernel: tpu_custom_call.1
= control target key start
LH: loop header
LB: loop body
LE: loop exit
PB: predicated region body
PF: predicated region fallthrough
CT: control target
= control target key end

     0   :  { %7 = vsyncpa [#allocation3], 0  ;;  %s122_s0 = inlined_call_operand.hbm [shape: f32[4,128], index: 0, kind: input, shape index: {}]   ;;  %s123_s1 = inlined_call_operand.vmem [shape: f32[1,128], index: 1, kind: input, shape index: {}]   ;;  %s124_s2 = inlined_call_operand.hbm [shape: f32[4,128], index: 2, kind: output, shape index: {}]  }
   0x1   :  { %8 = vsyncpa [#allocation4], 0  ;;  %s96_s9 = smov [#allocation2]  }
   0x2   :  { %s15_s10 = sshll.u32 %s96_s9, 4  ;;  %s16_s10 = int_to_ptr.vmem [resolvable:$true] %s15_s10 }
   0x3   :  { %s60_s11 = scalar_lea.vmem %s16_s10, 64  ;;  %p65_p1 = scmp.lt.s32.totalorder %s16_s10, %s16_s10 }
   0x4   :  { %p61_p0 = scmp.ne.s32.totalorder %s16_s10, %s60_s11  ;;  %p66_p2 = scmp.lt.s32.totalorder %s60_s11, %s60_s11 }
   0x6   :  { %p67_p3 = por %p66_p2, %p65_p1 }
   0x8   :  { %p68_p4 = pnand %p67_p3, %p61_p0 }
   0xa   :  { %71 = shalt.err (!%p68_p4)
}
   0xb   :  { %18 = dma.hbm_to_vmem [thread:$0]  %s122_s0, 64, %s16_s10, [#allocation3]  }
   0xc   :  { %92 = dma.done.wait [#allocation3], 64  }
   0xd   :  { %93 = vsyncadd [#allocation3], 4294967232  ;;  %s97_s14 = smov [#allocation5]   ;;  %v24_v0 = vld [vmem:[#allocation2] sm:$0xf] }
   0xe   :  { %s40_s15 = sshll.u32 %s97_s14, 4  ;;  %v49_v1 = vld [vmem:[%s123_s1] ss:$0 sm:$0xff]  ;;  %s41_s15 = int_to_ptr.vmem [resolvable:$true] %s40_s15 }
   0xf   :  { %v32_v2 = vmul.f32 %v49_v1, %v24_v0  ;;  %s72_s18 = scalar_lea.vmem %s41_s15, 64  ;;  %p77_p6 = scmp.lt.s32.totalorder %s41_s15, %s41_s15 }
  0x10   :  { %p73_p5 = scmp.ne.s32.totalorder %s41_s15, %s72_s18  ;;  %p78_p7 = scmp.lt.s32.totalorder %s72_s18, %s72_s18 }
  0x11   :  { %33 = vst [vmem:[#allocation5] sm:$0xf] %v32_v2 }
  0x12   :  { %p79_p8 = por %p78_p7, %p77_p6 }
  0x14   :  { %p80_p9 = pnand %p79_p8, %p73_p5 }
  0x16   :  { %83 = shalt.err (!%p80_p9)
}
  0x17   :  { %43 = dma.vmem_to_hbm [thread:$0]  %s41_s15, 64, %s124_s2, [#allocation4]  }
  0x18   :  { %94 = dma.done.wait [#allocation4], 64  }
  0x19   :  { %95 = vsyncadd [#allocation4], 4294967232 }
  0x1a   :  { %47 = vsyncpa [#allocation3], 1 }
  0x1b   :  { %48 = vsyncpa [#allocation4], 1 }

</bundles_post_ra>
